<compile_context>
chip_gen: v7x
topology: tpu7x:2x2x1
jax: 0.10.0
libtpu: 0.0.40
codegen_flags: <defaults>
</compile_context>

<pallas_src>
import math

import jax
import jax.numpy as jnp
from jax.experimental import pallas as pl
from jax.experimental.pallas import tpu as pltpu


def _round_up(n, m):
    return ((n + m - 1) // m) * m


def model_kernel(xa_ref, w12_ref, w3_ref, o_ref):
    # [x | RA | 1 | 0] @ [W1 ; W2 ; b12 ; 0] -> [h1+b1 | h2+b2 | 1 | 0], f32 accumulate.
    h = jnp.dot(xa_ref[...], w12_ref[...], preferred_element_type=jnp.float32)
    # ReLU in f32: padded columns stay 0, the bias-carrier column stays exactly 1.0.
    h = jnp.maximum(h, 0.0)
    # relu(h) @ [W3 ; b3 ; 0]  -> y + b3, operands bf16, f32 accumulate.
    o_ref[...] = jnp.dot(h.astype(jnp.bfloat16), w3_ref[...],
                         preferred_element_type=jnp.float32)


def model_forward(x, ra, params):
    w1, b1, w2, b2, w3, b3 = params           # weights pre-transposed to (in, out)
    B, D = x.shape
    H = w3.shape[0]                            # hidden_dim
    O = w3.shape[1]                            # output_dim
    half = H // 2

    # ---- lane-dense padded dimensions (always leave room for the ones/bias rows) ----
    D_pad = _round_up(D + 2, 128)              # +1 col RA, +1 col constant 1
    H_pad = _round_up(H + 1, 128)              # +1 col bias-carrier for b3
    O_pad = _round_up(O, 128)

    # ---- batch tiling (sublane-aligned) ----
    TM = 256 if B >= 256 else _round_up(B, 8)
    B_pad = _round_up(B, TM)
    nb = B_pad // TM

    # ---- fused, padded input slab: [x | RA | 1 | zeros] -> bf16 ----
    xa = jnp.zeros((B_pad, D_pad), jnp.float32)
    xa = xa.at[:B, :D].set(x)
    xa = xa.at[:B, D].set(ra[:, 0])
    xa = xa.at[:, D + 1].set(1.0)              # bias-carrier column (exact in bf16)
    xa = xa.astype(jnp.bfloat16)

    # ---- combined first-layer weight with folded biases ----
    w12 = jnp.zeros((D_pad, H_pad), jnp.float32)
    w12 = w12.at[:D, :half].set(w1)            # x  path -> columns [0, half)
    w12 = w12.at[D, half:H].set(w2[0])         # RA path -> columns [half, H)
    w12 = w12.at[D + 1, :half].set(b1)         # b1 via ones column
    w12 = w12.at[D + 1, half:H].set(b2)        # b2 via ones column
    w12 = w12.at[D + 1, H].set(1.0)            # h[:, H] == 1.0 -> carries b3 later
    w12 = w12.astype(jnp.bfloat16)

    # ---- padded final layer with folded bias ----
    w3_pad = jnp.zeros((H_pad, O_pad), jnp.float32)
    w3_pad = w3_pad.at[:H, :O].set(w3)
    w3_pad = w3_pad.at[H, :O].set(b3)          # b3 row, picked up by the 1.0 column
    w3_pad = w3_pad.astype(jnp.bfloat16)

    resident = lambda shape: pl.BlockSpec(shape, lambda i: (0, 0))

    out_pad = pl.pallas_call(
        model_kernel,
        out_shape=jax.ShapeDtypeStruct((B_pad, O_pad), jnp.float32),
        grid=(nb,),
        in_specs=[
            pl.BlockSpec((TM, D_pad), lambda i: (i, 0)),   # fused input, batch-tiled
            resident((D_pad, H_pad)),                      # W12 (+biases), resident
            resident((H_pad, O_pad)),                      # W3  (+bias),   resident
        ],
        out_specs=pl.BlockSpec((TM, O_pad), lambda i: (i, 0)),
        compiler_params=pltpu.CompilerParams(
            dimension_semantics=("parallel",)),            # megacore on v7x
    )(xa, w12, w3_pad)

    # slice the padding back off
    return out_pad[:B, :O]


def init_params(key, input_dim, hidden_dim, output_dim):
    """Deterministic init mirroring nn.Linear default (uniform +-1/sqrt(fan_in)).
    Weights stored pre-transposed as (in_features, out_features)."""
    half = hidden_dim // 2
    ks = jax.random.split(key, 6)

    def lin(kw, kb, fan_in, fan_out):
        bound = 1.0 / math.sqrt(fan_in)
        w = jax.random.uniform(kw, (fan_in, fan_out), jnp.float32, -bound, bound)
        b = jax.random.uniform(kb, (fan_out,), jnp.float32, -bound, bound)
        return w, b

    w1, b1 = lin(ks[0], ks[1], input_dim, half)            # fc1
    w2, b2 = lin(ks[2], ks[3], 1, half)                    # fc2
    w3, b3 = lin(ks[4], ks[5], hidden_dim, output_dim)     # final fc
    return (w1, b1, w2, b2, w3, b3)


def reference_forward(x, ra, params):
    """Pure-JAX f32 reference reproducing the PyTorch forward exactly."""
    w1, b1, w2, b2, w3, b3 = params
    h1 = x @ w1 + b1
    h2 = ra @ w2 + b2
    h = jnp.concatenate([h1, h2], axis=1)
    h = jnp.maximum(h, 0.0)
    return h @ w3 + b3


if __name__ == "__main__":
    B, input_dim, hidden_dim, output_dim = 8, 32, 32, 8

    key = jax.random.PRNGKey(0)
    kx, kra, kp = jax.random.split(key, 3)
    x = jax.random.normal(kx, (B, input_dim), jnp.float32)
    ra = jax.random.normal(kra, (B, 1), jnp.float32)
    params = init_params(kp, input_dim, hidden_dim, output_dim)

    fwd = jax.jit(model_forward)
    out = jax.block_until_ready(fwd(x, ra, params))

    ref = reference_forward(x, ra, params)
    assert out.shape == (B, output_dim)
    # bf16 matmul operands / folded biases -> tolerance loosened vs exact-f32 reference
    assert jnp.allclose(out, ref, atol=2e-2, rtol=2e-2), "mismatch vs reference"

    print("KERNEL_OK")
</pallas_src>

<mosaic_0001>
module attributes {stable_mosaic.version = 11 : i64} {
  func.func @model_kernel(%arg0: i32, %arg1: memref<8x128xbf16, #tpu.memory_space<vmem>>, %arg2: memref<128x128xbf16, #tpu.memory_space<vmem>>, %arg3: memref<128x128xbf16, #tpu.memory_space<vmem>>, %arg4: memref<8x128xf32, #tpu.memory_space<vmem>>) attributes {dimension_semantics = [#tpu.dimension_semantics<parallel>], iteration_bounds = array<i64: 1>, scalar_prefetch = 0 : i64, scratch_operands = 0 : i64, tpu.core_type = #tpu.core_type<tc>, window_params = [{transform_indices = @transform_0, window_bounds = array<i64: 8, 128>}, {pipeline_mode = #tpu.pipeline_mode<synchronous>, transform_indices = @transform_1, window_bounds = array<i64: 128, 128>}, {pipeline_mode = #tpu.pipeline_mode<synchronous>, transform_indices = @transform_2, window_bounds = array<i64: 128, 128>}, {transform_indices = @transform_3, window_bounds = array<i64: 8, 128>}]} {
    %c0 = arith.constant 0 : index
    %c0_0 = arith.constant 0 : index
    %0 = vector.load %arg1[%c0, %c0_0] : memref<8x128xbf16, #tpu.memory_space<vmem>>, vector<8x128xbf16>
    %c0_1 = arith.constant 0 : index
    %c0_2 = arith.constant 0 : index
    %1 = vector.load %arg2[%c0_1, %c0_2] : memref<128x128xbf16, #tpu.memory_space<vmem>>, vector<128x128xbf16>
    %cst = arith.constant dense<0.000000e+00> : vector<8x128xf32>
    %2 = tpu.matmul %0, %1, %cst {dimension_numbers = #tpu.dot_dimension_numbers<[1], [0], [0], [1], [0, 0, 1, 1], [], []>} : vector<8x128xbf16>, vector<128x128xbf16>, vector<8x128xf32> -> vector<8x128xf32>
    %cst_3 = arith.constant 0.000000e+00 : f32
    %3 = vector.broadcast %cst_3 : f32 to vector<8x128xf32>
    %4 = arith.maximumf %2, %3 : vector<8x128xf32>
    %5 = arith.truncf %4 : vector<8x128xf32> to vector<8x128xbf16>
    %c0_4 = arith.constant 0 : index
    %c0_5 = arith.constant 0 : index
    %6 = vector.load %arg3[%c0_4, %c0_5] : memref<128x128xbf16, #tpu.memory_space<vmem>>, vector<128x128xbf16>
    %cst_6 = arith.constant dense<0.000000e+00> : vector<8x128xf32>
    %7 = tpu.matmul %5, %6, %cst_6 {dimension_numbers = #tpu.dot_dimension_numbers<[1], [0], [0], [1], [0, 0, 1, 1], [], []>} : vector<8x128xbf16>, vector<128x128xbf16>, vector<8x128xf32> -> vector<8x128xf32>
    %c0_7 = arith.constant 0 : index
    %c0_8 = arith.constant 0 : index
    %8 = vector.load %arg4[%c0_7, %c0_8] : memref<8x128xf32, #tpu.memory_space<vmem>>, vector<8x128xf32>
    tpu.vector_store %arg4[%c0_7, %c0_8], %7 {strides = array<i32>} : memref<8x128xf32, #tpu.memory_space<vmem>>, vector<8x128xf32>,
    return
  }
  func.func @transform_0(%arg0: i32) -> (i32, i32) {
    %c0_i32 = arith.constant 0 : i32
    %c0_i32_0 = arith.constant 0 : i32
    return %arg0, %c0_i32 : i32, i32
  }
  func.func @transform_1(%arg0: i32) -> (i32, i32) {
    %c0_i32 = arith.constant 0 : i32
    %c0_i32_0 = arith.constant 0 : i32
    %c0_i32_1 = arith.constant 0 : i32
    return %c0_i32, %c0_i32_0 : i32, i32
  }
  func.func @transform_2(%arg0: i32) -> (i32, i32) {
    %c0_i32 = arith.constant 0 : i32
    %c0_i32_0 = arith.constant 0 : i32
    %c0_i32_1 = arith.constant 0 : i32
    return %c0_i32, %c0_i32_0 : i32, i32
  }
  func.func @transform_3(%arg0: i32) -> (i32, i32) {
    %c0_i32 = arith.constant 0 : i32
    %c0_i32_0 = arith.constant 0 : i32
    return %arg0, %c0_i32 : i32, i32
  }
}

</mosaic_0001>

<bundles_post_ra>
// kernel: model_forward.1
= control target key start
LH: loop header
LB: loop body
LE: loop exit
PB: predicated region body
PF: predicated region fallthrough
CT: control target
= control target key end

     0   :  { %v359_v1 = vmov 0.0   ;;  %vm360_vm0 = vmmov 0   ;;  %s445_s0 = inlined_call_operand.vmem [shape: bf16[8,128], index: 0, kind: input, shape index: {}]   ;;  %s446_s1 = inlined_call_operand.vmem [shape: bf16[128,128], index: 1, kind: input, shape index: {}]   ;;  %s447_s2 = inlined_call_operand.vmem [shape: bf16[128,128], index: 2, kind: input, shape index: {}]   ;;  %s448_s3 = inlined_call_operand.hbm [shape: f32[8,128], index: 3, kind: output, shape index: {}]  }
   0x1   :  { %v319_v0 = vld [vmem:[%s446_s1] sm:$0xff]   ;;  %276 = vmatprep.subr.bf16.mxu0 %v359_v1  ;;  %296 = vmatprep.subr.bf16.mxu1 %v359_v1  ;;  %v320_v2 = vld [vmem:[%s446_s1 + $0x8] sm:$0xff]   ;;  %v321_v3 = vld [vmem:[%s446_s1 + $0x10] sm:$0xff]  }
   0x2   :  { %277 = vmatpush3.bf16.msra.mxu0 %v319_v0  ;;  %292 = vmatprep.mubr.msk.bf16.mxu0 %vm360_vm0, %v359_v1  ;;  %v327_v4 = vld [vmem:[%s447_s2] sm:$0xff]   ;;  %v322_v5 = vld [vmem:[%s446_s1 + $0x18] sm:$0xff]   ;;  %v328_v6 = vld [vmem:[%s447_s2 + $0x8] sm:$0xff]  }
   0x3   :  { %278 = vmatprep.subr.bf16.mxu0 %v359_v1  ;;  %312 = vmatprep.mubr.msk.bf16.mxu1 %vm360_vm0, %v359_v1  ;;  %v323_v7 = vld [vmem:[%s446_s1 + $0x20] sm:$0xff]   ;;  %v329_v8 = vld [vmem:[%s447_s2 + $0x10] sm:$0xff]  }
   0x4   :  { %297 = vmatpush3.bf16.msra.mxu1 %v327_v4 }
   0x5   :  { %298 = vmatprep.subr.bf16.mxu1 %v359_v1 }
   0x6   :  { %279 = vmatpush3.bf16.msra.mxu0 %v320_v2 }
   0x7   :  { %280 = vmatprep.subr.bf16.mxu0 %v359_v1 }
   0x8   :  { %299 = vmatpush3.bf16.msra.mxu1 %v328_v6 }
   0x9   :  { %300 = vmatprep.subr.bf16.mxu1 %v359_v1 }
   0xa   :  { %281 = vmatpush3.bf16.msra.mxu0 %v321_v3 }
   0xb   :  { %282 = vmatprep.subr.bf16.mxu0 %v359_v1 }
   0xe   :  { %283 = vmatpush3.bf16.msra.mxu0 %v322_v5 }
   0xf   :  { %284 = vmatprep.subr.bf16.mxu0 %v359_v1 }
  0x10   :  { %8 = vsyncpa [#allocation3], 0  ;;  %v324_v9 = vld [vmem:[%s446_s1 + $0x28] sm:$0xff]   ;;  %301 = vmatpush3.bf16.msra.mxu1 %v329_v8  ;;  %v330_v10 = vld [vmem:[%s447_s2 + $0x18] sm:$0xff]  }
  0x11   :  { %302 = vmatprep.subr.bf16.mxu1 %v359_v1  ;;  %v325_v11 = vld [vmem:[%s446_s1 + $0x30] sm:$0xff]   ;;  %v331_v12 = vld [vmem:[%s447_s2 + $0x20] sm:$0xff]   ;;  %v326_v13 = vld [vmem:[%s446_s1 + $0x38] sm:$0xff]  }
  0x12   :  { %285 = vmatpush3.bf16.msra.mxu0 %v323_v7  ;;  %v332_v14 = vld [vmem:[%s447_s2 + $0x28] sm:$0xff]   ;;  %v16_v15 = vld [vmem:[%s445_s0] sm:$0xf]  ;;  %v333_v16 = vld [vmem:[%s447_s2 + $0x30] sm:$0xff]   ;;  %s361_s0 = smov [#allocation2]  }
  0x13   :  { %286 = vmatprep.subr.bf16.mxu0 %v359_v1  ;;  %v334_v17 = vld [vmem:[%s447_s2 + $0x38] sm:$0xff]   ;;  %s234_s18 = sshll.u32 %s361_s0, 4  ;;  %s235_s18 = int_to_ptr.vmem [resolvable:$true] %s234_s18 }
  0x14   :  { %303 = vmatpush3.bf16.msra.mxu1 %v330_v10  ;;  %s335_s19 = scalar_lea.vmem %s235_s18, 128  ;;  %p340_p1 = scmp.lt.s32.totalorder %s235_s18, %s235_s18 }
  0x15   :  { %304 = vmatprep.subr.bf16.mxu1 %v359_v1  ;;  %p336_p0 = scmp.ne.s32.totalorder %s235_s18, %s335_s19  ;;  %p341_p2 = scmp.lt.s32.totalorder %s335_s19, %s335_s19 }
  0x16   :  { %287 = vmatpush3.bf16.msra.mxu0 %v324_v9 }
  0x17   :  { %288 = vmatprep.subr.bf16.mxu0 %v359_v1  ;;  %p342_p3 = por %p341_p2, %p340_p1 }
  0x18   :  { %305 = vmatpush3.bf16.msra.mxu1 %v331_v12 }
  0x19   :  { %306 = vmatprep.subr.bf16.mxu1 %v359_v1  ;;  %p343_p4 = pnand %p342_p3, %p336_p0 }
  0x1a   :  { %289 = vmatpush3.bf16.msra.mxu0 %v325_v11 }
  0x1b   :  { %290 = vmatprep.subr.bf16.mxu0 %v359_v1 }
  0x1c   :  { %307 = vmatpush3.bf16.msra.mxu1 %v332_v14 }
  0x1d   :  { %308 = vmatprep.subr.bf16.mxu1 %v359_v1 }
  0x1e   :  { %291 = vmatpush3.bf16.msra.mxu0 %v326_v13 }
  0x20   :  { %309 = vmatpush3.bf16.msra.mxu1 %v333_v16 }
  0x21   :  { %293 = vmatmul.mubr.bf16.vlgmr.msra.gmra.mrb[0].mxu0 %v16_v15  ;;  %310 = vmatprep.subr.bf16.mxu1 %v359_v1 }
  0x24   :  { %311 = vmatpush3.bf16.msra.mxu1 %v334_v17 }
  0xf4   :  { %v115_v18 = vpop.f32.mrb[0].mxu0 }
  0xf5   :  { %v121_v19 = vmax.f32 %v115_v18, 0.0  ;;  %v294_v20 = vpop.f32.mrb[1].mxu0 }
  0xf6   :  { %v118_v21 = vpop.f32.mrb[2].mxu0 }
  0xf7   :  { %v122_v22 = vpack.c.bf16 %v121_v19, %v121_v19  ;;  %v295_v23 = vpop.f32.mrb[3].mxu0 }
  0xf9   :  { %313 = vmatmul.mubr.bf16.vlgmr.msra.gmra.mrb[0].mxu1 %v122_v22 }
 0x1cc   :  { %v221_v24 = vpop.f32.mrb[0].mxu1 }
 0x1cd   :  { %227 = vst [vmem:[#allocation2] sm:$0xff] %v221_v24  ;;  %v314_v25 = vpop.f32.mrb[1].mxu1 }
 0x1ce   :  { %v224_v26 = vpop.f32.mrb[2].mxu1 }
 0x1cf   :  { %346 = shalt.err (!%p343_p4)
}
 0x1d0   :  { %s347_s21 = scalar_lea.hbm %s448_s3, 128 }
 0x1d1   :  { %p348_p5 = scmp.ne.s32.totalorder %s448_s3, %s347_s21  ;;  %p351_p6 = scmp.lt.u32.totalorder %s347_s21, %s448_s3 }
 0x1d3   :  { %p353_p7 = pnand %p351_p6, %p348_p5 }
 0x1d5   :  { %356 = shalt.err (!%p353_p7)
}
 0x1d6   :  { %237 = dma.vmem_to_hbm [thread:$0]  %s235_s18, 128, %s448_s3, [#allocation3]   ;;  %v315_v27 = vpop.f32.mrb[3].mxu1 }
 0x1d7   :  { %357 = dma.done.wait [#allocation3], 128  }
 0x1d8   :  { %358 = vsyncadd [#allocation3], 4294967168 }
 0x1d9   :  { %241 = vsyncpa [#allocation3], 1 }

</bundles_post_ra>
